<compile_context>
chip_gen: v7x
topology: tpu7x:2x2x1
jax: 0.10.0
libtpu: 0.0.40
codegen_flags: <defaults>
</compile_context>

<pallas_src>
import jax
import jax.numpy as jnp
from jax.experimental import pallas as pl
from jax.experimental.pallas import tpu as pltpu


_LANE_TILE_CAP = 8192                      # lanes per block (multiple of 128)


def _actnorm_kernel(x_ref, loc_ref, scale_ref, out_ref):
    # x_ref:     (TR, TC)  rows = batch*channel on sublanes, spatial on lanes
    # loc_ref:   (TR, 1)   per-row shift, broadcast across lanes
    # scale_ref: (TR, 1)   per-row scale
    # out_ref:   (TR, TC)  same dtype as the input
    x = x_ref[...].astype(jnp.float32)              # upcast in-kernel (VPU)
    y = scale_ref[...] * (x + loc_ref[...])         # f32 math
    out_ref[...] = y.astype(out_ref.dtype)          # narrow only on store


def _vmem_budget_bytes():
    try:
        cap = int(pltpu.get_tpu_info().vmem_capacity_bytes)
    except Exception:
        cap = 64 * 1024 * 1024                      # conservative: v7x per-TC
    return int(cap * 0.7)


def _pick_tiles(rows, hw, elem_bytes, block_bytes_target):
    """Row/lane tile sizes obeying the (8, 128) rule with a byte budget."""
    # Lane tile: full extent if small, else a 128-multiple cap (partial last
    # tile handled by cdiv + masked store only on that final block).
    tc = hw if hw <= _LANE_TILE_CAP else _LANE_TILE_CAP
    # Row tile: multiple of 8 (or the full extent), sized to the byte budget.
    tr = block_bytes_target // max(1, tc * elem_bytes)
    if tr >= rows or rows <= 8:
        tr = rows
    else:
        tr = min(max(8, (tr // 8) * 8), rows)
    return tr, tc


def actnorm_forward(x_nchw, loc, scale):
    """x_nchw: (N, C, H, W) in its native dtype.  loc/scale broadcastable to
    (1, C, 1, 1).  Returns (out, logdet) matching ActNorm.forward (post-init).
    """
    N, C, H, W = x_nchw.shape
    hw = H * W
    rows = N * C
    dtype = x_nchw.dtype
    elem_bytes = jnp.dtype(dtype).itemsize

    # Free view of the contiguous NCHW array: rows = n*C + c, lanes = h*W + w.
    x2 = x_nchw.reshape(rows, hw)

    loc_c = jnp.asarray(loc, jnp.float32).reshape(C)
    scale_c = jnp.asarray(scale, jnp.float32).reshape(C)
    # Per-row parameters (row = n*C + c  ->  channel c repeats every C rows).
    loc_r = jnp.tile(loc_c, (N,)).reshape(rows, 1)
    scale_r = jnp.tile(scale_c, (N,)).reshape(rows, 1)

    vmem_budget = _vmem_budget_bytes()
    block_target = min(8 * 1024 * 1024, vmem_budget // 5)
    tr, tc = _pick_tiles(rows, hw, elem_bytes, block_target)
    grid = (pl.cdiv(rows, tr), pl.cdiv(hw, tc))

    # Double-buffered x + out blocks (same dtype) plus tiny param blocks.
    block_bytes = tr * tc * elem_bytes
    vmem_limit = min(vmem_budget,
                     max(8 * 1024 * 1024, 5 * block_bytes + (2 << 20)))

    out2 = pl.pallas_call(
        _actnorm_kernel,
        out_shape=jax.ShapeDtypeStruct((rows, hw), dtype),
        grid_spec=pltpu.PrefetchScalarGridSpec(
            num_scalar_prefetch=0,
            grid=grid,
            in_specs=[
                pl.BlockSpec((tr, tc), lambda i, j: (i, j)),
                pl.BlockSpec((tr, 1), lambda i, j: (i, 0)),
                pl.BlockSpec((tr, 1), lambda i, j: (i, 0)),
            ],
            out_specs=pl.BlockSpec((tr, tc), lambda i, j: (i, j)),
        ),
        compiler_params=pltpu.CompilerParams(
            dimension_semantics=("parallel", "parallel"),
            vmem_limit_bytes=vmem_limit),
    )(x2, loc_r, scale_r)

    out = out2.reshape(N, C, H, W)
    # Data-independent logdet: H*W * sum(log(|scale| + 1e-6)), plain JAX.
    logdet = jnp.float32(hw) * jnp.sum(jnp.log(jnp.abs(scale_c) + 1e-6))
    return out, logdet


def actnorm_initialize(x_nchw):
    """Plain-JAX equivalent of ActNorm.initialize (first-call data init)."""
    C = x_nchw.shape[1]
    xr = jnp.transpose(x_nchw.astype(jnp.float32), (1, 0, 2, 3)).reshape(C, -1)
    mean = jnp.mean(xr, axis=1)
    std = jnp.std(xr, axis=1, ddof=1) + 1e-6        # torch.std is unbiased
    loc = (-mean).reshape(1, C, 1, 1)
    scale = (1.0 / std).reshape(1, C, 1, 1)
    return loc, scale


def reference_forward(x_nchw, loc, scale):
    """Pure-JAX reference matching ActNorm.forward (post-init)."""
    H, W = x_nchw.shape[2], x_nchw.shape[3]
    out = (jnp.asarray(scale, jnp.float32)
           * (x_nchw.astype(jnp.float32) + jnp.asarray(loc, jnp.float32)))
    logdet = H * W * jnp.sum(jnp.log(jnp.abs(jnp.asarray(scale, jnp.float32))
                                     + 1e-6))
    return out.astype(x_nchw.dtype), logdet


if __name__ == "__main__":
    N, C, H, W = 2, 4, 16, 16

    key = jax.random.PRNGKey(0)
    x = jax.random.normal(key, (N, C, H, W), jnp.float32) * 1.7 + 0.3

    # Emulate the first forward call: data-dependent init, then the kernel.
    loc, scale = actnorm_initialize(x)

    out, logdet = actnorm_forward(x, loc, scale)
    jax.block_until_ready((out, logdet))

    out_ref, ld_ref = reference_forward(x, loc, scale)
    assert out.shape == (N, C, H, W) and out.dtype == x.dtype
    assert logdet.shape == ()
    assert jnp.allclose(out.astype(jnp.float32), out_ref.astype(jnp.float32),
                        rtol=1e-5, atol=1e-5), \
        float(jnp.max(jnp.abs(out.astype(jnp.float32)
                              - out_ref.astype(jnp.float32))))
    assert jnp.allclose(logdet, ld_ref, rtol=1e-5, atol=1e-5), \
        (float(logdet), float(ld_ref))
    print("KERNEL_OK")
</pallas_src>

<mosaic_0001>
module attributes {stable_mosaic.version = 11 : i64} {
  func.func @_actnorm_kernel(%arg0: i32, %arg1: i32, %arg2: memref<8x256xf32, #tpu.memory_space<vmem>>, %arg3: memref<8x1xf32, #tpu.memory_space<vmem>>, %arg4: memref<8x1xf32, #tpu.memory_space<vmem>>, %arg5: memref<8x256xf32, #tpu.memory_space<vmem>>) attributes {dimension_semantics = [#tpu.dimension_semantics<parallel>, #tpu.dimension_semantics<parallel>], iteration_bounds = array<i64: 1, 1>, scalar_prefetch = 0 : i64, scratch_operands = 0 : i64, tpu.core_type = #tpu.core_type<tc>, window_params = [{transform_indices = @transform_0, window_bounds = array<i64: 8, 256>}, {transform_indices = @transform_1, window_bounds = array<i64: 8, 1>}, {transform_indices = @transform_2, window_bounds = array<i64: 8, 1>}, {transform_indices = @transform_3, window_bounds = array<i64: 8, 256>}]} {
    %c0 = arith.constant 0 : index
    %c0_0 = arith.constant 0 : index
    %0 = vector.load %arg2[%c0, %c0_0] : memref<8x256xf32, #tpu.memory_space<vmem>>, vector<8x256xf32>
    %c0_1 = arith.constant 0 : index
    %c0_2 = arith.constant 0 : index
    %1 = vector.load %arg4[%c0_1, %c0_2] : memref<8x1xf32, #tpu.memory_space<vmem>>, vector<8x1xf32>
    %c0_3 = arith.constant 0 : index
    %c0_4 = arith.constant 0 : index
    %2 = vector.load %arg3[%c0_3, %c0_4] : memref<8x1xf32, #tpu.memory_space<vmem>>, vector<8x1xf32>
    %3 = vector.broadcast %2 : vector<8x1xf32> to vector<8x256xf32>
    %4 = arith.addf %0, %3 : vector<8x256xf32>
    %5 = vector.broadcast %1 : vector<8x1xf32> to vector<8x256xf32>
    %6 = arith.mulf %5, %4 : vector<8x256xf32>
    %c0_5 = arith.constant 0 : index
    %c0_6 = arith.constant 0 : index
    %7 = vector.load %arg5[%c0_5, %c0_6] : memref<8x256xf32, #tpu.memory_space<vmem>>, vector<8x256xf32>
    tpu.vector_store %arg5[%c0_5, %c0_6], %6 {strides = array<i32>} : memref<8x256xf32, #tpu.memory_space<vmem>>, vector<8x256xf32>,
    return
  }
  func.func @transform_0(%arg0: i32, %arg1: i32) -> (i32, i32) {
    %c0_i32 = arith.constant 0 : i32
    return %arg0, %arg1 : i32, i32
  }
  func.func @transform_1(%arg0: i32, %arg1: i32) -> (i32, i32) {
    %c0_i32 = arith.constant 0 : i32
    %c0_i32_0 = arith.constant 0 : i32
    return %arg0, %c0_i32 : i32, i32
  }
  func.func @transform_2(%arg0: i32, %arg1: i32) -> (i32, i32) {
    %c0_i32 = arith.constant 0 : i32
    %c0_i32_0 = arith.constant 0 : i32
    return %arg0, %c0_i32 : i32, i32
  }
  func.func @transform_3(%arg0: i32, %arg1: i32) -> (i32, i32) {
    %c0_i32 = arith.constant 0 : i32
    return %arg0, %arg1 : i32, i32
  }
}

</mosaic_0001>

<bundles_post_ra>
// kernel: tpu_custom_call.1
= control target key start
LH: loop header
LB: loop body
LE: loop exit
PB: predicated region body
PF: predicated region fallthrough
CT: control target
= control target key end

     0   :  { %s122_s0 = inlined_call_operand.vmem [shape: f32[8,256], index: 0, kind: input, shape index: {}]   ;;  %s123_s1 = inlined_call_operand.vmem [shape: f32[8,1], index: 1, kind: input, shape index: {}]   ;;  %s124_s2 = inlined_call_operand.vmem [shape: f32[8,1], index: 2, kind: input, shape index: {}]   ;;  %s125_s3 = inlined_call_operand.hbm [shape: f32[8,256], index: 3, kind: output, shape index: {}]  }
   0x1   :  { %v18_v0 = vld [vmem:[%s123_s1] sm:$0xff] }
   0x2   :  { %8 = vsyncpa [#allocation3], 0  ;;  %v76_v1 = vmov 0   ;;  %v17_v2 = vld [vmem:[%s124_s2] sm:$0xff]  ;;  %v16_v5 = vld [vmem:[%s122_s0 + $0x8] sm:$0xff]  ;;  %s77_s20 = smov [#allocation2]  }
   0x3   :  { %51 = vset.pattern.permute.xlu0 %v76_v1  ;;  %v15_v4 = vld [vmem:[%s122_s0] sm:$0xff]  ;;  %s41_s1 = sshll.u32 %s77_s20, 4  ;;  %s42_s1 = int_to_ptr.vmem [resolvable:$true] %s41_s1 }
   0x4   :  { %21 = vperm.xlu0 %51, %v18_v0   ;;  %s52_s2 = scalar_lea.vmem %s42_s1, 256  ;;  %p57_p1 = scmp.lt.s32.totalorder %s42_s1, %s42_s1 }
   0x5   :  { %p53_p0 = scmp.ne.s32.totalorder %s42_s1, %s52_s2  ;;  %p58_p2 = scmp.lt.s32.totalorder %s52_s2, %s52_s2 }
   0x7   :  { %p59_p3 = por %p58_p2, %p57_p1 }
   0x8   :  { %28 = vperm.xlu0 %51, %v17_v2  }
   0x9   :  { %p60_p4 = pnand %p59_p3, %p53_p0 }
  0x83   :  { %v22_v3 = vpop.permute.xlu0 %21 }
  0x84   :  { %v24_v6 = vadd.f32 %v22_v3, %v15_v4  ;;  %v25_v7 = vadd.f32 %v22_v3, %v16_v5 }
  0x87   :  { %v29_v8 = vpop.permute.xlu0 %28 }
  0x88   :  { %v31_v9 = vmul.f32 %v29_v8, %v24_v6  ;;  %v32_v10 = vmul.f32 %v29_v8, %v25_v7 }
  0x8a   :  { %33 = vst [vmem:[#allocation2] sm:$0xff] %v31_v9  ;;  %34 = vst [vmem:[#allocation2 + $0x8] sm:$0xff] %v32_v10 }
  0x8b   :  { %63 = shalt.err (!%p60_p4)
}
  0x8c   :  { %s64_s0 = scalar_lea.hbm %s125_s3, 256 }
  0x8d   :  { %p65_p5 = scmp.ne.s32.totalorder %s125_s3, %s64_s0  ;;  %p68_p6 = scmp.lt.u32.totalorder %s64_s0, %s125_s3 }
  0x8f   :  { %p70_p7 = pnand %p68_p6, %p65_p5 }
  0x91   :  { %73 = shalt.err (!%p70_p7)
}
  0x92   :  { %44 = dma.vmem_to_hbm [thread:$0]  %s42_s1, 256, %s125_s3, [#allocation3]  }
  0x93   :  { %74 = dma.done.wait [#allocation3], 256  }
  0x94   :  { %75 = vsyncadd [#allocation3], 4294967040 }
  0x95   :  { %48 = vsyncpa [#allocation3], 1 }

</bundles_post_ra>
